<compile_context>
chip_gen: v6e
topology: v6e:2x2x1
jax: 0.10.0
libtpu: 0.0.40
codegen_flags: <defaults>
</compile_context>

<pallas_src>
import jax
import jax.numpy as jnp
from jax.experimental import pallas as pl
from jax.experimental.pallas import tpu as pltpu


def lstm_kernel(x2d_ref, wih_ref, whh_ref, b_ref, wfc_h_ref, wfc_c_ref,
                bfc_ref, out_ref, gx_scr):
    """Whole-sequence LSTM forward in one kernel invocation.

    x2d_ref   : (T*N, D)    pre-flattened input sequence (time-major rows)
    wih_ref   : (D, 4H)     input->hidden weights, gates packed on lanes
    whh_ref   : (H, 4H)     hidden->hidden weights, gates packed on lanes
    b_ref     : (1, 4H)     combined bias (b_ih + b_hh), gates on lanes
    wfc_h_ref : (1, H)      FC weights applied to h_n
    wfc_c_ref : (1, H)      FC weights applied to c_n
    bfc_ref   : (1, 1)      FC bias
    out_ref   : (N, 1)      sigmoid scores
    gx_scr    : (T*N, 4H)   VMEM scratch: precomputed input-side gates
    """
    TN, _ = x2d_ref.shape
    H4 = whh_ref.shape[-1]
    H = H4 // 4
    N = out_ref.shape[0]
    T = TN // N

    # ---- Phase 1: time-batched input projection (independent of h) -------
    # One full-lane-width MXU dot for all gates of all T steps; bias
    # broadcast hoisted out of the recurrence.  Lane-dense (.., 4H=128)
    # scratch -> unmasked full-lane stores.
    gx_scr[...] = (jnp.dot(x2d_ref[...], wih_ref[...],
                           preferred_element_type=jnp.float32)
                   + b_ref[...])

    # g-gate (tanh) lane-selection mask; hoisted out of the loop.
    lane = jax.lax.broadcasted_iota(jnp.int32, (N, H4), 1)
    g_mask = (lane >= 2 * H) & (lane < 3 * H)

    # Hidden->hidden weight slab stays resident in vregs across all steps.
    whh = whh_ref[...]

    # ---- Phase 2: strictly serial recurrence over T -----------------------
    # Per step: one (N,H) x (H,4H) MXU dot, one sigmoid + one tanh over the
    # full packed vreg (EUP), a VPU select, and static lane slices (XLU).
    def step(t, carry):
        h, c = carry
        row = pl.multiple_of(t * N, N)
        gates = (gx_scr[pl.ds(row, N), :]
                 + jnp.dot(h, whh, preferred_element_type=jnp.float32))
        sig = jax.nn.sigmoid(gates)          # valid on i / f / o lanes
        tan = jnp.tanh(gates)                # valid on g lanes
        act = jnp.where(g_mask, tan, sig)    # packed activations (N, 4H)
        i_g = act[:, 0:H]
        f_g = act[:, H:2 * H]
        g_g = act[:, 2 * H:3 * H]
        o_g = act[:, 3 * H:4 * H]
        c_new = f_g * c + i_g * g_g
        h_new = o_g * jnp.tanh(c_new)
        return h_new, c_new

    h0 = jnp.zeros((N, H), jnp.float32)
    c0 = jnp.zeros((N, H), jnp.float32)
    h_n, c_n = jax.lax.fori_loop(0, T, step, (h0, c0), unroll=min(T, 8))

    # ---- Final FC: sigmoid(Linear(cat([h_n, c_n]))) as VPU mul + reduce ---
    logits = (jnp.sum(h_n * wfc_h_ref[...], axis=-1, keepdims=True)
              + jnp.sum(c_n * wfc_c_ref[...], axis=-1, keepdims=True)
              + bfc_ref[...])                                          # (N, 1)
    out_ref[...] = jax.nn.sigmoid(logits)


def lstm_forward(x_market, x_alter, params):
    """Pallas equivalent of the PyTorch LSTM module's forward pass."""
    x = jnp.concatenate([x_market, x_alter], axis=-1)                  # (T, N, D)
    T, N, D = x.shape
    H = params["whh4"].shape[0]
    x2d = x.reshape(T * N, D)            # flatten in XLA (free, tile-robust)

    # Scheduling hint for XLA around the long serial custom call.
    flops = 2 * T * N * D * 4 * H + 2 * T * N * H * 4 * H + 4 * N * H
    transcendentals = T * N * 9 * H + N
    bytes_accessed = 4 * (T * N * D + D * 4 * H + H * 4 * H + 4 * H
                          + 2 * H + 1 + N)
    cost = pl.CostEstimate(flops=flops, transcendentals=transcendentals,
                           bytes_accessed=bytes_accessed)

    # Explicit VMEM budget: inputs + scratch + outputs with generous headroom,
    # capped below v7x's 64 MiB physical VMEM.
    vmem_elems = (T * N * D + D * 4 * H + H * 4 * H + 4 * H + 2 * H + 1
                  + T * N * 4 * H + N)
    vmem_limit = int(min(max(3 * 4 * vmem_elems + (1 << 20), 8 << 20), 48 << 20))

    vmem_spec = pl.BlockSpec(memory_space=pltpu.MemorySpace.VMEM)
    out = pl.pallas_call(
        lstm_kernel,
        out_shape=jax.ShapeDtypeStruct((N, 1), jnp.float32),
        in_specs=[vmem_spec] * 7,
        out_specs=vmem_spec,
        scratch_shapes=[pltpu.VMEM((T * N, 4 * H), jnp.float32)],
        compiler_params=pltpu.CompilerParams(vmem_limit_bytes=vmem_limit),
        cost_estimate=cost,
    )(x2d, params["wih4"], params["whh4"], params["b4"],
      params["wfc_h"], params["wfc_c"], params["bfc"])
    return out[:, 0]                                                   # (N,)


def lstm_reference(x_market, x_alter, p):
    """Pure-JAX reference (lax.scan) matching PyTorch nn.LSTM + fc semantics."""
    x = jnp.concatenate([x_market, x_alter], axis=-1)                  # (T, N, D)
    N = x.shape[1]
    H = p["whh4"].shape[0]

    def step(carry, x_t):
        h, c = carry
        gates = x_t @ p["wih4"] + h @ p["whh4"] + p["b4"]              # (N, 4H)
        i_g = jax.nn.sigmoid(gates[:, 0:H])
        f_g = jax.nn.sigmoid(gates[:, H:2 * H])
        g_g = jnp.tanh(gates[:, 2 * H:3 * H])
        o_g = jax.nn.sigmoid(gates[:, 3 * H:4 * H])
        c_new = f_g * c + i_g * g_g
        h_new = o_g * jnp.tanh(c_new)
        return (h_new, c_new), None

    h0 = jnp.zeros((N, H), jnp.float32)
    c0 = jnp.zeros((N, H), jnp.float32)
    (h_n, c_n), _ = jax.lax.scan(step, (h0, c0), x)
    logits = (jnp.sum(h_n * p["wfc_h"], axis=-1, keepdims=True)
              + jnp.sum(c_n * p["wfc_c"], axis=-1, keepdims=True)
              + p["bfc"])
    return jax.nn.sigmoid(logits)[:, 0]


def init_params(key, d_in, hidn_rnn):
    """Deterministic parameter init (uniform, PyTorch-style scale).

    Weights are packed with the 4 gates (PyTorch order i, f, g, o) laid out
    along the lane (last) dimension so all in-kernel ops run at full lane
    width (4H = 128 when H = 32).
    """
    H = hidn_rnn
    k = 1.0 / jnp.sqrt(jnp.float32(H))
    keys = jax.random.split(key, 6)
    w_ih = jax.random.uniform(keys[0], (4 * H, d_in), jnp.float32, -k, k)
    w_hh = jax.random.uniform(keys[1], (4 * H, H), jnp.float32, -k, k)
    b_ih = jax.random.uniform(keys[2], (4 * H,), jnp.float32, -k, k)
    b_hh = jax.random.uniform(keys[3], (4 * H,), jnp.float32, -k, k)
    kf = 1.0 / jnp.sqrt(jnp.float32(2 * H))
    w_fc = jax.random.uniform(keys[4], (1, 2 * H), jnp.float32, -kf, kf)
    b_fc = jax.random.uniform(keys[5], (1,), jnp.float32, -kf, kf)
    return {
        "wih4": jnp.transpose(w_ih),                     # (D, 4H)  lanes = i|f|g|o
        "whh4": jnp.transpose(w_hh),                     # (H, 4H)
        "b4": (b_ih + b_hh).reshape(1, 4 * H),           # (1, 4H)
        "wfc_h": w_fc[:, :H],                            # (1, H)
        "wfc_c": w_fc[:, H:],                            # (1, H)
        "bfc": b_fc.reshape(1, 1),                       # (1, 1)
    }


if __name__ == "__main__":
    # Small shapes consistent with the module: seq T=8, num_stock N=8,
    # d_market=4, d_alter=4, hidn_rnn=32.
    T, N, d_market, d_alter, hidn_rnn = 8, 8, 4, 4, 32
    key = jax.random.PRNGKey(0)
    k_m, k_a, k_p = jax.random.split(key, 3)

    x_market = jax.random.normal(k_m, (T, N, d_market), jnp.float32)
    x_alter = jax.random.normal(k_a, (T, N, d_alter), jnp.float32)
    params = init_params(k_p, d_market + d_alter, hidn_rnn)

    scores = jax.block_until_ready(lstm_forward(x_market, x_alter, params))
    ref = jax.block_until_ready(lstm_reference(x_market, x_alter, params))

    assert scores.shape == (N,)
    assert jnp.allclose(scores, ref, atol=2e-5, rtol=2e-5), (scores, ref)
    print("KERNEL_OK")
</pallas_src>

<mosaic_0001>
module attributes {stable_mosaic.version = 11 : i64} {
  func.func @lstm_kernel(%arg0: memref<64x8xf32, #tpu.memory_space<vmem>>, %arg1: memref<8x128xf32, #tpu.memory_space<vmem>>, %arg2: memref<32x128xf32, #tpu.memory_space<vmem>>, %arg3: memref<1x128xf32, #tpu.memory_space<vmem>>, %arg4: memref<1x32xf32, #tpu.memory_space<vmem>>, %arg5: memref<1x32xf32, #tpu.memory_space<vmem>>, %arg6: memref<1x1xf32, #tpu.memory_space<vmem>>, %arg7: memref<8x1xf32, #tpu.memory_space<vmem>>, %arg8: memref<64x128xf32, #tpu.memory_space<vmem>>) attributes {dimension_semantics = [], scalar_prefetch = 0 : i64, scratch_operands = 1 : i64, tpu.core_type = #tpu.core_type<tc>} {
    %c0 = arith.constant 0 : index
    %c0_0 = arith.constant 0 : index
    %0 = vector.load %arg0[%c0, %c0_0] : memref<64x8xf32, #tpu.memory_space<vmem>>, vector<64x8xf32>
    %c0_1 = arith.constant 0 : index
    %c0_2 = arith.constant 0 : index
    %1 = vector.load %arg1[%c0_1, %c0_2] : memref<8x128xf32, #tpu.memory_space<vmem>>, vector<8x128xf32>
    %cst = arith.constant dense<0.000000e+00> : vector<64x128xf32>
    %2 = tpu.matmul %0, %1, %cst {dimension_numbers = #tpu.dot_dimension_numbers<[1], [0], [0], [1], [0, 0, 1, 1], [], []>} : vector<64x8xf32>, vector<8x128xf32>, vector<64x128xf32> -> vector<64x128xf32>
    %c0_3 = arith.constant 0 : index
    %c0_4 = arith.constant 0 : index
    %3 = vector.load %arg3[%c0_3, %c0_4] : memref<1x128xf32, #tpu.memory_space<vmem>>, vector<1x128xf32>
    %4 = vector.broadcast %3 : vector<1x128xf32> to vector<64x128xf32>
    %5 = arith.addf %2, %4 : vector<64x128xf32>
    %c0_5 = arith.constant 0 : index
    %c0_6 = arith.constant 0 : index
    %6 = vector.load %arg8[%c0_5, %c0_6] : memref<64x128xf32, #tpu.memory_space<vmem>>, vector<64x128xf32>
    tpu.vector_store %arg8[%c0_5, %c0_6], %5 {strides = array<i32>} : memref<64x128xf32, #tpu.memory_space<vmem>>, vector<64x128xf32>,
    %7 = tpu.iota {dimensions = array<i32: 1>} : vector<8x128xi32>
    %c64_i32 = arith.constant 64 : i32
    %8 = vector.broadcast %c64_i32 : i32 to vector<8x128xi32>
    %9 = arith.cmpi sge, %7, %8 : vector<8x128xi32>
    %c96_i32 = arith.constant 96 : i32
    %10 = vector.broadcast %c96_i32 : i32 to vector<8x128xi32>
    %11 = arith.cmpi slt, %7, %10 : vector<8x128xi32>
    %12 = arith.andi %9, %11 : vector<8x128xi1>
    %c0_7 = arith.constant 0 : index
    %c0_8 = arith.constant 0 : index
    %13 = vector.load %arg2[%c0_7, %c0_8] : memref<32x128xf32, #tpu.memory_space<vmem>>, vector<32x128xf32>
    %cst_9 = arith.constant 0.000000e+00 : f32
    %14 = vector.broadcast %cst_9 : f32 to vector<8x32xf32>
    %cst_10 = arith.constant 0.000000e+00 : f32
    %15 = vector.broadcast %cst_10 : f32 to vector<8x32xf32>
    %c0_i32 = arith.constant 0 : i32
    %c8_i32 = arith.constant 8 : i32
    %16 = arith.muli %c0_i32, %c8_i32 : i32
    %17 = tpu.assume_multiple %16, 8 : i32
    %18 = arith.index_cast %17 : i32 to index
    %c0_11 = arith.constant 0 : index
    %19 = vector.load %arg8[%18, %c0_11] : memref<64x128xf32, #tpu.memory_space<vmem>>, vector<8x128xf32>
    %cst_12 = arith.constant dense<0.000000e+00> : vector<8x128xf32>
    %20 = tpu.matmul %14, %13, %cst_12 {dimension_numbers = #tpu.dot_dimension_numbers<[1], [0], [0], [1], [0, 0, 1, 1], [], []>} : vector<8x32xf32>, vector<32x128xf32>, vector<8x128xf32> -> vector<8x128xf32>
    %21 = arith.addf %19, %20 : vector<8x128xf32>
    %22 = arith.negf %21 : vector<8x128xf32>
    %23 = math.exp %22 : vector<8x128xf32>
    %cst_13 = arith.constant 1.000000e+00 : f32
    %24 = vector.broadcast %cst_13 : f32 to vector<8x128xf32>
    %25 = arith.addf %24, %23 : vector<8x128xf32>
    %26 = arith.divf %24, %25 : vector<8x128xf32>
    %27 = math.tanh %21 : vector<8x128xf32>
    %28 = arith.select %12, %27, %26 : vector<8x128xi1>, vector<8x128xf32>
    %29 = vector.extract_strided_slice %28 {offsets = [0, 0], sizes = [8, 32], strides = [1, 1]} : vector<8x128xf32> to vector<8x32xf32>
    %30 = vector.extract_strided_slice %28 {offsets = [0, 32], sizes = [8, 32], strides = [1, 1]} : vector<8x128xf32> to vector<8x32xf32>
    %31 = vector.extract_strided_slice %28 {offsets = [0, 64], sizes = [8, 32], strides = [1, 1]} : vector<8x128xf32> to vector<8x32xf32>
    %32 = vector.extract_strided_slice %28 {offsets = [0, 96], sizes = [8, 32], strides = [1, 1]} : vector<8x128xf32> to vector<8x32xf32>
    %33 = arith.mulf %30, %15 : vector<8x32xf32>
    %34 = arith.mulf %29, %31 : vector<8x32xf32>
    %35 = arith.addf %33, %34 : vector<8x32xf32>
    %36 = math.tanh %35 : vector<8x32xf32>
    %37 = arith.mulf %32, %36 : vector<8x32xf32>
    %c1_i32 = arith.constant 1 : i32
    %c8_i32_14 = arith.constant 8 : i32
    %38 = arith.muli %c1_i32, %c8_i32_14 : i32
    %39 = tpu.assume_multiple %38, 8 : i32
    %40 = arith.index_cast %39 : i32 to index
    %c0_15 = arith.constant 0 : index
    %41 = vector.load %arg8[%40, %c0_15] : memref<64x128xf32, #tpu.memory_space<vmem>>, vector<8x128xf32>
    %cst_16 = arith.constant dense<0.000000e+00> : vector<8x128xf32>
    %42 = tpu.matmul %37, %13, %cst_16 {dimension_numbers = #tpu.dot_dimension_numbers<[1], [0], [0], [1], [0, 0, 1, 1], [], []>} : vector<8x32xf32>, vector<32x128xf32>, vector<8x128xf32> -> vector<8x128xf32>
    %43 = arith.addf %41, %42 : vector<8x128xf32>
    %44 = arith.negf %43 : vector<8x128xf32>
    %45 = math.exp %44 : vector<8x128xf32>
    %cst_17 = arith.constant 1.000000e+00 : f32
    %46 = vector.broadcast %cst_17 : f32 to vector<8x128xf32>
    %47 = arith.addf %46, %45 : vector<8x128xf32>
    %48 = arith.divf %46, %47 : vector<8x128xf32>
    %49 = math.tanh %43 : vector<8x128xf32>
    %50 = arith.select %12, %49, %48 : vector<8x128xi1>, vector<8x128xf32>
    %51 = vector.extract_strided_slice %50 {offsets = [0, 0], sizes = [8, 32], strides = [1, 1]} : vector<8x128xf32> to vector<8x32xf32>
    %52 = vector.extract_strided_slice %50 {offsets = [0, 32], sizes = [8, 32], strides = [1, 1]} : vector<8x128xf32> to vector<8x32xf32>
    %53 = vector.extract_strided_slice %50 {offsets = [0, 64], sizes = [8, 32], strides = [1, 1]} : vector<8x128xf32> to vector<8x32xf32>
    %54 = vector.extract_strided_slice %50 {offsets = [0, 96], sizes = [8, 32], strides = [1, 1]} : vector<8x128xf32> to vector<8x32xf32>
    %55 = arith.mulf %52, %35 : vector<8x32xf32>
    %56 = arith.mulf %51, %53 : vector<8x32xf32>
    %57 = arith.addf %55, %56 : vector<8x32xf32>
    %58 = math.tanh %57 : vector<8x32xf32>
    %59 = arith.mulf %54, %58 : vector<8x32xf32>
    %c2_i32 = arith.constant 2 : i32
    %c8_i32_18 = arith.constant 8 : i32
    %60 = arith.muli %c2_i32, %c8_i32_18 : i32
    %61 = tpu.assume_multiple %60, 8 : i32
    %62 = arith.index_cast %61 : i32 to index
    %c0_19 = arith.constant 0 : index
    %63 = vector.load %arg8[%62, %c0_19] : memref<64x128xf32, #tpu.memory_space<vmem>>, vector<8x128xf32>
    %cst_20 = arith.constant dense<0.000000e+00> : vector<8x128xf32>
    %64 = tpu.matmul %59, %13, %cst_20 {dimension_numbers = #tpu.dot_dimension_numbers<[1], [0], [0], [1], [0, 0, 1, 1], [], []>} : vector<8x32xf32>, vector<32x128xf32>, vector<8x128xf32> -> vector<8x128xf32>
    %65 = arith.addf %63, %64 : vector<8x128xf32>
    %66 = arith.negf %65 : vector<8x128xf32>
    %67 = math.exp %66 : vector<8x128xf32>
    %cst_21 = arith.constant 1.000000e+00 : f32
    %68 = vector.broadcast %cst_21 : f32 to vector<8x128xf32>
    %69 = arith.addf %68, %67 : vector<8x128xf32>
    %70 = arith.divf %68, %69 : vector<8x128xf32>
    %71 = math.tanh %65 : vector<8x128xf32>
    %72 = arith.select %12, %71, %70 : vector<8x128xi1>, vector<8x128xf32>
    %73 = vector.extract_strided_slice %72 {offsets = [0, 0], sizes = [8, 32], strides = [1, 1]} : vector<8x128xf32> to vector<8x32xf32>
    %74 = vector.extract_strided_slice %72 {offsets = [0, 32], sizes = [8, 32], strides = [1, 1]} : vector<8x128xf32> to vector<8x32xf32>
    %75 = vector.extract_strided_slice %72 {offsets = [0, 64], sizes = [8, 32], strides = [1, 1]} : vector<8x128xf32> to vector<8x32xf32>
    %76 = vector.extract_strided_slice %72 {offsets = [0, 96], sizes = [8, 32], strides = [1, 1]} : vector<8x128xf32> to vector<8x32xf32>
    %77 = arith.mulf %74, %57 : vector<8x32xf32>
    %78 = arith.mulf %73, %75 : vector<8x32xf32>
    %79 = arith.addf %77, %78 : vector<8x32xf32>
    %80 = math.tanh %79 : vector<8x32xf32>
    %81 = arith.mulf %76, %80 : vector<8x32xf32>
    %c3_i32 = arith.constant 3 : i32
    %c8_i32_22 = arith.constant 8 : i32
    %82 = arith.muli %c3_i32, %c8_i32_22 : i32
    %83 = tpu.assume_multiple %82, 8 : i32
    %84 = arith.index_cast %83 : i32 to index
    %c0_23 = arith.constant 0 : index
    %85 = vector.load %arg8[%84, %c0_23] : memref<64x128xf32, #tpu.memory_space<vmem>>, vector<8x128xf32>
    %cst_24 = arith.constant dense<0.000000e+00> : vector<8x128xf32>
    %86 = tpu.matmul %81, %13, %cst_24 {dimension_numbers = #tpu.dot_dimension_numbers<[1], [0], [0], [1], [0, 0, 1, 1], [], []>} : vector<8x32xf32>, vector<32x128xf32>, vector<8x128xf32> -> vector<8x128xf32>
    %87 = arith.addf %85, %86 : vector<8x128xf32>
    %88 = arith.negf %87 : vector<8x128xf32>
    %89 = math.exp %88 : vector<8x128xf32>
    %cst_25 = arith.constant 1.000000e+00 : f32
    %90 = vector.broadcast %cst_25 : f32 to vector<8x128xf32>
    %91 = arith.addf %90, %89 : vector<8x128xf32>
    %92 = arith.divf %90, %91 : vector<8x128xf32>
    %93 = math.tanh %87 : vector<8x128xf32>
    %94 = arith.select %12, %93, %92 : vector<8x128xi1>, vector<8x128xf32>
    %95 = vector.extract_strided_slice %94 {offsets = [0, 0], sizes = [8, 32], strides = [1, 1]} : vector<8x128xf32> to vector<8x32xf32>
    %96 = vector.extract_strided_slice %94 {offsets = [0, 32], sizes = [8, 32], strides = [1, 1]} : vector<8x128xf32> to vector<8x32xf32>
    %97 = vector.extract_strided_slice %94 {offsets = [0, 64], sizes = [8, 32], strides = [1, 1]} : vector<8x128xf32> to vector<8x32xf32>
    %98 = vector.extract_strided_slice %94 {offsets = [0, 96], sizes = [8, 32], strides = [1, 1]} : vector<8x128xf32> to vector<8x32xf32>
    %99 = arith.mulf %96, %79 : vector<8x32xf32>
    %100 = arith.mulf %95, %97 : vector<8x32xf32>
    %101 = arith.addf %99, %100 : vector<8x32xf32>
    %102 = math.tanh %101 : vector<8x32xf32>
    %103 = arith.mulf %98, %102 : vector<8x32xf32>
    %c4_i32 = arith.constant 4 : i32
    %c8_i32_26 = arith.constant 8 : i32
    %104 = arith.muli %c4_i32, %c8_i32_26 : i32
    %105 = tpu.assume_multiple %104, 8 : i32
    %106 = arith.index_cast %105 : i32 to index
    %c0_27 = arith.constant 0 : index
    %107 = vector.load %arg8[%106, %c0_27] : memref<64x128xf32, #tpu.memory_space<vmem>>, vector<8x128xf32>
    %cst_28 = arith.constant dense<0.000000e+00> : vector<8x128xf32>
    %108 = tpu.matmul %103, %13, %cst_28 {dimension_numbers = #tpu.dot_dimension_numbers<[1], [0], [0], [1], [0, 0, 1, 1], [], []>} : vector<8x32xf32>, vector<32x128xf32>, vector<8x128xf32> -> vector<8x128xf32>
    %109 = arith.addf %107, %108 : vector<8x128xf32>
    %110 = arith.negf %109 : vector<8x128xf32>
    %111 = math.exp %110 : vector<8x128xf32>
    %cst_29 = arith.constant 1.000000e+00 : f32
    %112 = vector.broadcast %cst_29 : f32 to vector<8x128xf32>
    %113 = arith.addf %112, %111 : vector<8x128xf32>
    %114 = arith.divf %112, %113 : vector<8x128xf32>
    %115 = math.tanh %109 : vector<8x128xf32>
    %116 = arith.select %12, %115, %114 : vector<8x128xi1>, vector<8x128xf32>
    %117 = vector.extract_strided_slice %116 {offsets = [0, 0], sizes = [8, 32], strides = [1, 1]} : vector<8x128xf32> to vector<8x32xf32>
    %118 = vector.extract_strided_slice %116 {offsets = [0, 32], sizes = [8, 32], strides = [1, 1]} : vector<8x128xf32> to vector<8x32xf32>
    %119 = vector.extract_strided_slice %116 {offsets = [0, 64], sizes = [8, 32], strides = [1, 1]} : vector<8x128xf32> to vector<8x32xf32>
    %120 = vector.extract_strided_slice %116 {offsets = [0, 96], sizes = [8, 32], strides = [1, 1]} : vector<8x128xf32> to vector<8x32xf32>
    %121 = arith.mulf %118, %101 : vector<8x32xf32>
    %122 = arith.mulf %117, %119 : vector<8x32xf32>
    %123 = arith.addf %121, %122 : vector<8x32xf32>
    %124 = math.tanh %123 : vector<8x32xf32>
    %125 = arith.mulf %120, %124 : vector<8x32xf32>
    %c5_i32 = arith.constant 5 : i32
    %c8_i32_30 = arith.constant 8 : i32
    %126 = arith.muli %c5_i32, %c8_i32_30 : i32
    %127 = tpu.assume_multiple %126, 8 : i32
    %128 = arith.index_cast %127 : i32 to index
    %c0_31 = arith.constant 0 : index
    %129 = vector.load %arg8[%128, %c0_31] : memref<64x128xf32, #tpu.memory_space<vmem>>, vector<8x128xf32>
    %cst_32 = arith.constant dense<0.000000e+00> : vector<8x128xf32>
    %130 = tpu.matmul %125, %13, %cst_32 {dimension_numbers = #tpu.dot_dimension_numbers<[1], [0], [0], [1], [0, 0, 1, 1], [], []>} : vector<8x32xf32>, vector<32x128xf32>, vector<8x128xf32> -> vector<8x128xf32>
    %131 = arith.addf %129, %130 : vector<8x128xf32>
    %132 = arith.negf %131 : vector<8x128xf32>
    %133 = math.exp %132 : vector<8x128xf32>
    %cst_33 = arith.constant 1.000000e+00 : f32
    %134 = vector.broadcast %cst_33 : f32 to vector<8x128xf32>
    %135 = arith.addf %134, %133 : vector<8x128xf32>
    %136 = arith.divf %134, %135 : vector<8x128xf32>
    %137 = math.tanh %131 : vector<8x128xf32>
    %138 = arith.select %12, %137, %136 : vector<8x128xi1>, vector<8x128xf32>
    %139 = vector.extract_strided_slice %138 {offsets = [0, 0], sizes = [8, 32], strides = [1, 1]} : vector<8x128xf32> to vector<8x32xf32>
    %140 = vector.extract_strided_slice %138 {offsets = [0, 32], sizes = [8, 32], strides = [1, 1]} : vector<8x128xf32> to vector<8x32xf32>
    %141 = vector.extract_strided_slice %138 {offsets = [0, 64], sizes = [8, 32], strides = [1, 1]} : vector<8x128xf32> to vector<8x32xf32>
    %142 = vector.extract_strided_slice %138 {offsets = [0, 96], sizes = [8, 32], strides = [1, 1]} : vector<8x128xf32> to vector<8x32xf32>
    %143 = arith.mulf %140, %123 : vector<8x32xf32>
    %144 = arith.mulf %139, %141 : vector<8x32xf32>
    %145 = arith.addf %143, %144 : vector<8x32xf32>
    %146 = math.tanh %145 : vector<8x32xf32>
    %147 = arith.mulf %142, %146 : vector<8x32xf32>
    %c6_i32 = arith.constant 6 : i32
    %c8_i32_34 = arith.constant 8 : i32
    %148 = arith.muli %c6_i32, %c8_i32_34 : i32
    %149 = tpu.assume_multiple %148, 8 : i32
    %150 = arith.index_cast %149 : i32 to index
    %c0_35 = arith.constant 0 : index
    %151 = vector.load %arg8[%150, %c0_35] : memref<64x128xf32, #tpu.memory_space<vmem>>, vector<8x128xf32>
    %cst_36 = arith.constant dense<0.000000e+00> : vector<8x128xf32>
    %152 = tpu.matmul %147, %13, %cst_36 {dimension_numbers = #tpu.dot_dimension_numbers<[1], [0], [0], [1], [0, 0, 1, 1], [], []>} : vector<8x32xf32>, vector<32x128xf32>, vector<8x128xf32> -> vector<8x128xf32>
    %153 = arith.addf %151, %152 : vector<8x128xf32>
    %154 = arith.negf %153 : vector<8x128xf32>
    %155 = math.exp %154 : vector<8x128xf32>
    %cst_37 = arith.constant 1.000000e+00 : f32
    %156 = vector.broadcast %cst_37 : f32 to vector<8x128xf32>
    %157 = arith.addf %156, %155 : vector<8x128xf32>
    %158 = arith.divf %156, %157 : vector<8x128xf32>
    %159 = math.tanh %153 : vector<8x128xf32>
    %160 = arith.select %12, %159, %158 : vector<8x128xi1>, vector<8x128xf32>
    %161 = vector.extract_strided_slice %160 {offsets = [0, 0], sizes = [8, 32], strides = [1, 1]} : vector<8x128xf32> to vector<8x32xf32>
    %162 = vector.extract_strided_slice %160 {offsets = [0, 32], sizes = [8, 32], strides = [1, 1]} : vector<8x128xf32> to vector<8x32xf32>
    %163 = vector.extract_strided_slice %160 {offsets = [0, 64], sizes = [8, 32], strides = [1, 1]} : vector<8x128xf32> to vector<8x32xf32>
    %164 = vector.extract_strided_slice %160 {offsets = [0, 96], sizes = [8, 32], strides = [1, 1]} : vector<8x128xf32> to vector<8x32xf32>
    %165 = arith.mulf %162, %145 : vector<8x32xf32>
    %166 = arith.mulf %161, %163 : vector<8x32xf32>
    %167 = arith.addf %165, %166 : vector<8x32xf32>
    %168 = math.tanh %167 : vector<8x32xf32>
    %169 = arith.mulf %164, %168 : vector<8x32xf32>
    %c7_i32 = arith.constant 7 : i32
    %c8_i32_38 = arith.constant 8 : i32
    %170 = arith.muli %c7_i32, %c8_i32_38 : i32
    %171 = tpu.assume_multiple %170, 8 : i32
    %172 = arith.index_cast %171 : i32 to index
    %c0_39 = arith.constant 0 : index
    %173 = vector.load %arg8[%172, %c0_39] : memref<64x128xf32, #tpu.memory_space<vmem>>, vector<8x128xf32>
    %cst_40 = arith.constant dense<0.000000e+00> : vector<8x128xf32>
    %174 = tpu.matmul %169, %13, %cst_40 {dimension_numbers = #tpu.dot_dimension_numbers<[1], [0], [0], [1], [0, 0, 1, 1], [], []>} : vector<8x32xf32>, vector<32x128xf32>, vector<8x128xf32> -> vector<8x128xf32>
    %175 = arith.addf %173, %174 : vector<8x128xf32>
    %176 = arith.negf %175 : vector<8x128xf32>
    %177 = math.exp %176 : vector<8x128xf32>
    %cst_41 = arith.constant 1.000000e+00 : f32
    %178 = vector.broadcast %cst_41 : f32 to vector<8x128xf32>
    %179 = arith.addf %178, %177 : vector<8x128xf32>
    %180 = arith.divf %178, %179 : vector<8x128xf32>
    %181 = math.tanh %175 : vector<8x128xf32>
    %182 = arith.select %12, %181, %180 : vector<8x128xi1>, vector<8x128xf32>
    %183 = vector.extract_strided_slice %182 {offsets = [0, 0], sizes = [8, 32], strides = [1, 1]} : vector<8x128xf32> to vector<8x32xf32>
    %184 = vector.extract_strided_slice %182 {offsets = [0, 32], sizes = [8, 32], strides = [1, 1]} : vector<8x128xf32> to vector<8x32xf32>
    %185 = vector.extract_strided_slice %182 {offsets = [0, 64], sizes = [8, 32], strides = [1, 1]} : vector<8x128xf32> to vector<8x32xf32>
    %186 = vector.extract_strided_slice %182 {offsets = [0, 96], sizes = [8, 32], strides = [1, 1]} : vector<8x128xf32> to vector<8x32xf32>
    %187 = arith.mulf %184, %167 : vector<8x32xf32>
    %188 = arith.mulf %183, %185 : vector<8x32xf32>
    %189 = arith.addf %187, %188 : vector<8x32xf32>
    %190 = math.tanh %189 : vector<8x32xf32>
    %191 = arith.mulf %186, %190 : vector<8x32xf32>
    %c8_i32_42 = arith.constant 8 : i32
    %c0_43 = arith.constant 0 : index
    %c0_44 = arith.constant 0 : index
    %192 = vector.load %arg4[%c0_43, %c0_44] : memref<1x32xf32, #tpu.memory_space<vmem>>, vector<1x32xf32>
    %193 = vector.broadcast %192 : vector<1x32xf32> to vector<8x32xf32>
    %194 = arith.mulf %191, %193 : vector<8x32xf32>
    %cst_45 = arith.constant dense<0.000000e+00> : vector<8xf32>
    %195 = vector.multi_reduction <add>, %194, %cst_45 [1] : vector<8x32xf32> to vector<8xf32>
    %196 = vector.shape_cast %195 : vector<8xf32> to vector<8x1xf32>
    %c0_46 = arith.constant 0 : index
    %c0_47 = arith.constant 0 : index
    %197 = vector.load %arg5[%c0_46, %c0_47] : memref<1x32xf32, #tpu.memory_space<vmem>>, vector<1x32xf32>
    %198 = vector.broadcast %197 : vector<1x32xf32> to vector<8x32xf32>
    %199 = arith.mulf %189, %198 : vector<8x32xf32>
    %cst_48 = arith.constant dense<0.000000e+00> : vector<8xf32>
    %200 = vector.multi_reduction <add>, %199, %cst_48 [1] : vector<8x32xf32> to vector<8xf32>
    %201 = vector.shape_cast %200 : vector<8xf32> to vector<8x1xf32>
    %202 = arith.addf %196, %201 : vector<8x1xf32>
    %c0_49 = arith.constant 0 : index
    %c0_50 = arith.constant 0 : index
    %203 = vector.load %arg6[%c0_49, %c0_50] : memref<1x1xf32, #tpu.memory_space<vmem>>, vector<1x1xf32>
    %204 = vector.broadcast %203 : vector<1x1xf32> to vector<8x1xf32>
    %205 = arith.addf %202, %204 : vector<8x1xf32>
    %206 = arith.negf %205 : vector<8x1xf32>
    %207 = math.exp %206 : vector<8x1xf32>
    %cst_51 = arith.constant 1.000000e+00 : f32
    %208 = vector.broadcast %cst_51 : f32 to vector<8x1xf32>
    %209 = arith.addf %208, %207 : vector<8x1xf32>
    %210 = arith.divf %208, %209 : vector<8x1xf32>
    %c0_52 = arith.constant 0 : index
    %c0_53 = arith.constant 0 : index
    %211 = vector.load %arg7[%c0_52, %c0_53] : memref<8x1xf32, #tpu.memory_space<vmem>>, vector<8x1xf32>
    tpu.vector_store %arg7[%c0_52, %c0_53], %210 {strides = array<i32>} : memref<8x1xf32, #tpu.memory_space<vmem>>, vector<8x1xf32>,
    return
  }
}

</mosaic_0001>

<bundles_post_ra>
// kernel: tpu_custom_call.1
= control target key start
LH: loop header
LB: loop body
LE: loop exit
PB: predicated region body
PF: predicated region fallthrough
CT: control target
= control target key end

     0   :  { %vm44_vm0 = vcmask 64512   ;;  %v1320_v0 = vmov 0.0   ;;  %vm1321_vm1 = vmmov 0   ;;  %v182_v18 = vlaneseq  ;;  %s1323_s15 = smov 32   ;;  %s1324_s29 = smov 96   ;;  %s1600_s1 = inlined_call_operand.vmem [shape: f32[8,128], index: 1, kind: input, shape index: {}]   ;;  %s1601_s2 = inlined_call_operand.vmem [shape: f32[32,128], index: 2, kind: input, shape index: {}]   ;;  %s1602_s0 = inlined_call_operand.vmem [shape: f32[64,8], index: 0, kind: input, shape index: {}]   ;;  %s1603_s3 = inlined_call_operand.vmem [shape: f32[1,128], index: 3, kind: input, shape index: {}]   ;;  %s1604_s4 = inlined_call_operand.vmem [shape: f32[1,32], index: 4, kind: input, shape index: {}]   ;;  %s1605_s5 = inlined_call_operand.vmem [shape: f32[1,32], index: 5, kind: input, shape index: {}]   ;;  %s1606_s6 = inlined_call_operand.<no memory space> [shape: f32[1,1], index: 6, kind: input, shape index: {}]   ;;  %s1607_s7 = inlined_call_operand.vmem [shape: f32[8,1], index: 7, kind: output, shape index: {}]  }
   0x1   :  { %1159 = vmatprep.subr.mxu1 %v1320_v0  ;;  %v36_v1 = vld [vmem:[%s1600_s1] sm:$0xff]  ;;  %v1372_v2 = vld [vmem:[%s1601_s2 + $0x18] sm:$0xff]  ;;  %1167 = vmatprep.mubr.msk.f32.mxu1 %vm1321_vm1, %v1320_v0  ;;  %v29_v4 = vld [vmem:[%s1602_s0 + $0x8] sm:$0xff]  ;;  %vm192_vm5 = vcmask 261120   ;;  %vm1062_vm6 = vcmask 7168  }
   0x2   :  { %v28_v3 = vld [vmem:[%s1602_s0] sm:$0xff]  ;;  %1145 = vmatprep.subr.mxu0 %v36_v1  ;;  %1160 = vmatpush3.msra.mxu1 %v1372_v2  ;;  %v1386_v5 = vld [vmem:[%s1601_s2 + $0x10] sm:$0xff]  ;;  %v1394_v6 = vld [vmem:[%s1601_s2 + $0x8] sm:$0xff]  ;;  %v183_v19 = vand.u32 127, %v182_v18 }
   0x3   :  { %1146 = vmatpush3.msra.mxu0 %v36_v1  ;;  %1147 = vmatprep.mubr.msk.f32.mxu0 %vm44_vm0, %v28_v3  ;;  %v1402_v7 = vld [vmem:[%s1601_s2] sm:$0xff]  ;;  %v30_v48 = vld [vmem:[%s1602_s0 + $0x10] sm:$0xff]  ;;  %v31_v49 = vld [vmem:[%s1602_s0 + $0x18] sm:$0xff] }
   0x4   :  { %1161 = vmatprep.subr.mxu1 %v1320_v0  ;;  %1148 = vmatmul.mubr.msk.f32.vlgmr.msra.gmra.mxu0 %vm44_vm0, %v29_v4  ;;  %v1430_v9 = vld [vmem:[%s1603_s3] ss:$0 sm:$0xff]  ;;  %vm184_vm2 = vcmp.ge.s32.totalorder %v183_v19, 64  ;;  %vm185_vm3 = vcmp.lt.s32.totalorder %v183_v19, 96  ;;  %s1322_s3 = smov 64   ;;  %v33_v51 = vld [vmem:[%s1602_s0 + $0x28] sm:$0xff] }
   0x5   :  { %1162 = vmatpush3.msra.mxu1 %v1386_v5  ;;  %1181 = vmatprep.subr.mxu0 %v1320_v0  ;;  %vm1433_vm4 = vmand %vm184_vm2, %vm185_vm3  ;;  %v32_v50 = vld [vmem:[%s1602_s0 + $0x20] sm:$0xff]  ;;  %v34_v52 = vld [vmem:[%s1602_s0 + $0x30] sm:$0xff] }
   0x6   :  { %1163 = vmatprep.subr.mxu1 %v1320_v0  ;;  %1182 = vmatpush3.msra.mxu0 %v1372_v2  ;;  %v35_v53 = vld [vmem:[%s1602_s0 + $0x38] sm:$0xff]  ;;  %v1093_v20 = vld [vmem:[%s1605_s5] ss:$0 sm:$0xff] }
   0x7   :  { %1164 = vmatpush3.msra.mxu1 %v1394_v6  ;;  %1183 = vmatprep.subr.mxu0 %v1320_v0 }
   0x8   :  { %1165 = vmatprep.subr.mxu1 %v1320_v0  ;;  %1184 = vmatpush3.msra.mxu0 %v1386_v5 }
   0x9   :  { %1166 = vmatpush3.msra.mxu1 %v1402_v7  ;;  %1185 = vmatprep.subr.mxu0 %v1320_v0 }
   0xa   :  { %1168 = vmatmul.mubr.f32.vlgmr.msra.gmra.mxu1 %v1320_v0  ;;  %1170 = vmatprep.subr.mxu1 %v1320_v0 }
   0xb   :  { %1171 = vmatpush3.msra.mxu1 %v1372_v2  ;;  %1178 = vmatprep.mubr.msk.f32.mxu1 %vm1321_vm1, %v1320_v0 }
   0xc   :  { %1172 = vmatprep.subr.mxu1 %v1320_v0  ;;  %1186 = vmatpush3.msra.mxu0 %v1394_v6 }
   0xd   :  { %1173 = vmatpush3.msra.mxu1 %v1386_v5  ;;  %1187 = vmatprep.subr.mxu0 %v1320_v0 }
   0xe   :  { %1174 = vmatprep.subr.mxu1 %v1320_v0  ;;  %1188 = vmatpush3.msra.mxu0 %v1402_v7 }
   0xf   :  { %1175 = vmatpush3.msra.mxu1 %v1394_v6  ;;  %1203 = vmatprep.subr.mxu0 %v1320_v0 }
  0x10   :  { %1176 = vmatprep.subr.mxu1 %v1320_v0  ;;  %1150 = vmatprep.mubr.msk.f32.mxu0 %vm44_vm0, %v30_v48 }
  0x11   :  { %1177 = vmatpush3.msra.mxu1 %v1402_v7  ;;  %1151 = vmatmul.mubr.msk.f32.gmra.mxu0 %vm44_vm0, %v31_v49 }
  0x12   :  { %1192 = vmatprep.subr.mxu1 %v1320_v0  ;;  %1153 = vmatprep.mubr.msk.f32.mxu0 %vm44_vm0, %v32_v50 }
  0x15   :  { %1154 = vmatmul.mubr.msk.f32.gmra.mxu0 %vm44_vm0, %v33_v51 }
  0x16   :  { %1156 = vmatprep.mubr.msk.f32.mxu0 %vm44_vm0, %v34_v52 }
  0x19   :  { %1157 = vmatmul.mubr.msk.f32.gmra.mxu0 %vm44_vm0, %v35_v53 }
  0x1a   :  { %1189 = vmatprep.mubr.msk.f32.mxu0 %vm1321_vm1, %v1320_v0 }
  0xc4   :  { %v1149_v8 = vpop.f32.mrf.mxu0 }
  0xc5   :  { %v141_v33 = vadd.f32 %v1149_v8, %v1430_v9 }
  0xc6   :  { %v135_v10 = vpop.f32.mrf.mxu0 }
  0xc7   :  { %v136_v11 = vadd.f32 %v1430_v9, %v135_v10 }
  0xca   :  { %v262_v12 = vpop.f32.mrf.mxu1 }
  0xcb   :  { %v266_v13 = vadd.f32 %v262_v12, %v136_v11 }
  0xcc   :  { %v1169_v14 = vpop.f32.mrf.mxu1 }
  0xcd   :  { %v1077_v15 = vmul.f32 -1.442695, %v266_v13 }
  0xcf   :  { %1252 = vpow2.f32 %v1077_v15 }
  0xd0   :  { %1254 = vtanh.f32 %v266_v13 }
  0xd1   :  { %v1152_v58 = vpop.f32.mrf.mxu0 }
  0xd3   :  { %v145_v59 = vpop.f32.mrf.mxu0 }
  0xd4   :  { %v146_v1 = vadd.f32 %v1430_v9, %v145_v59 }
  0xd5   :  { %v1498_v60 = vpop.f32.mrf.mxu0 }
  0xd7   :  { %v1500_v61 = vpop.f32.mrf.mxu0 }
  0xd9   :  { %v1502_v62 = vpop.f32.mrf.mxu0 }
  0xdb   :  { %v1504_v63 = vpop.f32.mrf.mxu0 }
  0xdc   :  { %v1253_v16 = vpop.eup %1252 }
  0xdd   :  { %v270_v17 = vadd.f32 1.0, %v1253_v16  ;;  %v1255_v21 = vpop.eup %1254 }
  0xdf   :  { %1256 = vrcp.f32 %v270_v17 }
  0xec   :  { %v1257_v22 = vpop.eup %1256 }
  0xed   :  { %v274_v23 = vsel %vm1433_vm4, %v1255_v21, %v1257_v22 }
  0xee   :  { %277 = vrot.lane.b32.xlu0 %v274_v23, %s1322_s3  ;;  %v275_v26 = vmul.f32 0.0, %v274_v23 }
 0x160   :  { %v278_v24 = vpop.permute.xlu0 %277 }
 0x161   :  { %v280_v25 = vmul.f32 %v278_v24, %v274_v23 }
 0x163   :  { %282 = vrot.lane.b32.xlu0 %v280_v25, %s1323_s15 }
 0x1d5   :  { %v283_v27 = vpop.permute.xlu0 %282 }
 0x1d6   :  { %v285_v28 = vadd.f32 %v283_v27, %v275_v26  ;;  %v151_v26 = vadd.f32 %v1152_v58, %v1430_v9 }
 0x1d8   :  { %1258 = vtanh.f32 %v285_v28 }
 0x1e5   :  { %v1259_v29 = vpop.eup %1258 }
 0x1e6   :  { %288 = vrot.lane.b32.xlu1 %v1259_v29, %s1322_s3 }
 0x258   :  { %v289_v30 = vpop.permute.xlu1 %288 }
 0x259   :  { %v291_v31 = vmul.f32 %v289_v30, %v274_v23 }
 0x25b   :  { %295 = vrot.lane.b32.xlu1 %v291_v31, %s1323_s15 }
 0x2cd   :  { %v296_v32 = vpop.permute.xlu1 %295 }
 0x2ce   :  { %1179 = vmatmul.mubr.msk.f32.vlgmr.msra.gmra.mxu1 %vm192_vm5, %v296_v32 }
 0x2cf   :  { %1193 = vmatpush3.msra.mxu1 %v1372_v2  ;;  %1200 = vmatprep.mubr.msk.f32.mxu1 %vm1321_vm1, %v1320_v0 }
 0x2d0   :  { %1194 = vmatprep.subr.mxu1 %v1320_v0 }
 0x2d1   :  { %1195 = vmatpush3.msra.mxu1 %v1386_v5 }
 0x2d2   :  { %1196 = vmatprep.subr.mxu1 %v1320_v0 }
 0x2d3   :  { %1197 = vmatpush3.msra.mxu1 %v1394_v6 }
 0x2d4   :  { %1198 = vmatprep.subr.mxu1 %v1320_v0 }
 0x2d5   :  { %1199 = vmatpush3.msra.mxu1 %v1402_v7 }
 0x2d6   :  { %1214 = vmatprep.subr.mxu1 %v1320_v0 }
 0x38e   :  { %v365_v34 = vpop.f32.mrf.mxu1 }
 0x38f   :  { %v369_v35 = vadd.f32 %v365_v34, %v141_v33 }
 0x390   :  { %v1180_v36 = vpop.f32.mrf.mxu1 }
 0x391   :  { %v1079_v37 = vmul.f32 -1.442695, %v369_v35 }
 0x393   :  { %1260 = vpow2.f32 %v1079_v37 }
 0x394   :  { %1262 = vtanh.f32 %v369_v35 }
 0x3a0   :  { %v1261_v38 = vpop.eup %1260 }
 0x3a1   :  { %v373_v39 = vadd.f32 1.0, %v1261_v38  ;;  %v1263_v40 = vpop.eup %1262 }
 0x3a3   :  { %1264 = vrcp.f32 %v373_v39 }
 0x3b0   :  { %v1265_v41 = vpop.eup %1264 }
 0x3b1   :  { %v377_v42 = vsel %vm1433_vm4, %v1263_v40, %v1265_v41 }
 0x3b2   :  { %380 = vrot.lane.b32.xlu0 %v377_v42, %s1322_s3  ;;  %v378_v45 = vmul.f32 %v377_v42, %v285_v28 }
 0x424   :  { %v381_v43 = vpop.permute.xlu0 %380 }
 0x425   :  { %v383_v44 = vmul.f32 %v381_v43, %v377_v42 }
 0x427   :  { %385 = vrot.lane.b32.xlu1 %v383_v44, %s1323_s15 }
 0x499   :  { %v386_v46 = vpop.permute.xlu1 %385 }
 0x49a   :  { %v388_v47 = vadd.f32 %v386_v46, %v378_v45  ;;  %v156_v45 = vadd.f32 %v1430_v9, %v1500_v61 }
 0x49c   :  { %1266 = vtanh.f32 %v388_v47 }
 0x4a9   :  { %v1267_v54 = vpop.eup %1266 }
 0x4aa   :  { %391 = vrot.lane.b32.xlu0 %v1267_v54, %s1322_s3 }
 0x51c   :  { %v392_v55 = vpop.permute.xlu0 %391 }
 0x51d   :  { %v394_v56 = vmul.f32 %v392_v55, %v377_v42 }
 0x51f   :  { %398 = vrot.lane.b32.xlu1 %v394_v56, %s1323_s15 }
 0x591   :  { %v399_v57 = vpop.permute.xlu1 %398 }
 0x592   :  { %1190 = vmatmul.mubr.msk.f32.vlgmr.msra.gmra.mxu0 %vm192_vm5, %v399_v57 }
 0x593   :  { %1204 = vmatpush3.msra.mxu0 %v1372_v2  ;;  %1211 = vmatprep.mubr.msk.f32.mxu0 %vm1321_vm1, %v1320_v0 }
 0x594   :  { %1205 = vmatprep.subr.mxu0 %v1320_v0 }
 0x595   :  { %1206 = vmatpush3.msra.mxu0 %v1386_v5 }
 0x596   :  { %1207 = vmatprep.subr.mxu0 %v1320_v0 }
 0x597   :  { %1208 = vmatpush3.msra.mxu0 %v1394_v6 }
 0x598   :  { %1209 = vmatprep.subr.mxu0 %v1320_v0 }
 0x599   :  { %1210 = vmatpush3.msra.mxu0 %v1402_v7 }
 0x59a   :  { %1225 = vmatprep.subr.mxu0 %v1320_v0 }
 0x652   :  { %v468_v3 = vpop.f32.mrf.mxu0 }
 0x653   :  { %v472_v4 = vadd.f32 %v468_v3, %v146_v1 }
 0x654   :  { %v1191_v8 = vpop.f32.mrf.mxu0 }
 0x655   :  { %v1081_v10 = vmul.f32 -1.442695, %v472_v4  ;;  %v161_v8 = vadd.f32 %v1498_v60, %v1430_v9 }
 0x657   :  { %1268 = vpow2.f32 %v1081_v10 }
 0x658   :  { %1270 = vtanh.f32 %v472_v4 }
 0x664   :  { %v1269_v11 = vpop.eup %1268 }
 0x665   :  { %v476_v12 = vadd.f32 1.0, %v1269_v11  ;;  %v1271_v13 = vpop.eup %1270 }
 0x667   :  { %1272 = vrcp.f32 %v476_v12 }
 0x674   :  { %v1273_v14 = vpop.eup %1272 }
 0x675   :  { %v480_v15 = vsel %vm1433_vm4, %v1271_v13, %v1273_v14 }
 0x676   :  { %483 = vrot.lane.b32.xlu0 %v480_v15, %s1322_s3  ;;  %v481_v18 = vmul.f32 %v480_v15, %v388_v47 }
 0x6e8   :  { %v484_v16 = vpop.permute.xlu0 %483 }
 0x6e9   :  { %v486_v17 = vmul.f32 %v484_v16, %v480_v15 }
 0x6eb   :  { %488 = vrot.lane.b32.xlu1 %v486_v17, %s1323_s15 }
 0x75d   :  { %v489_v19 = vpop.permute.xlu1 %488 }
 0x75e   :  { %v491_v21 = vadd.f32 %v489_v19, %v481_v18 }
 0x760   :  { %1274 = vtanh.f32 %v491_v21 }
 0x76d   :  { %v1275_v22 = vpop.eup %1274 }
 0x76e   :  { %494 = vrot.lane.b32.xlu0 %v1275_v22, %s1322_s3 }
 0x7e0   :  { %v495_v23 = vpop.permute.xlu0 %494 }
 0x7e1   :  { %v497_v24 = vmul.f32 %v495_v23, %v480_v15  ;;  %v166_v23 = vadd.f32 %v1430_v9, %v1504_v63 }
 0x7e3   :  { %501 = vrot.lane.b32.xlu1 %v497_v24, %s1323_s15 }
 0x855   :  { %v502_v25 = vpop.permute.xlu1 %501 }
 0x856   :  { %1201 = vmatmul.mubr.msk.f32.vlgmr.msra.gmra.mxu1 %vm192_vm5, %v502_v25 }
 0x857   :  { %1215 = vmatpush3.msra.mxu1 %v1372_v2  ;;  %1222 = vmatprep.mubr.msk.f32.mxu1 %vm1321_vm1, %v1320_v0 }
 0x858   :  { %1216 = vmatprep.subr.mxu1 %v1320_v0 }
 0x859   :  { %1217 = vmatpush3.msra.mxu1 %v1386_v5 }
 0x85a   :  { %1218 = vmatprep.subr.mxu1 %v1320_v0 }
 0x85b   :  { %1219 = vmatpush3.msra.mxu1 %v1394_v6 }
 0x85c   :  { %1220 = vmatprep.subr.mxu1 %v1320_v0 }
 0x85d   :  { %1221 = vmatpush3.msra.mxu1 %v1402_v7 }
 0x85e   :  { %1236 = vmatprep.subr.mxu1 %v1320_v0 }
 0x916   :  { %v571_v27 = vpop.f32.mrf.mxu1 }
 0x917   :  { %v575_v28 = vadd.f32 %v571_v27, %v151_v26 }
 0x918   :  { %v1202_v29 = vpop.f32.mrf.mxu1 }
 0x919   :  { %v1083_v30 = vmul.f32 -1.442695, %v575_v28 }
 0x91b   :  { %1276 = vpow2.f32 %v1083_v30 }
 0x91c   :  { %1278 = vtanh.f32 %v575_v28 }
 0x928   :  { %v1277_v31 = vpop.eup %1276 }
 0x929   :  { %v579_v32 = vadd.f32 1.0, %v1277_v31  ;;  %v1279_v33 = vpop.eup %1278 }
 0x92b   :  { %1280 = vrcp.f32 %v579_v32 }
 0x938   :  { %v1281_v34 = vpop.eup %1280 }
 0x939   :  { %v583_v35 = vsel %vm1433_vm4, %v1279_v33, %v1281_v34 }
 0x93a   :  { %586 = vrot.lane.b32.xlu0 %v583_v35, %s1322_s3  ;;  %v584_v38 = vmul.f32 %v583_v35, %v491_v21 }
 0x9ac   :  { %v587_v36 = vpop.permute.xlu0 %586 }
 0x9ad   :  { %v589_v37 = vmul.f32 %v587_v36, %v583_v35 }
 0x9af   :  { %591 = vrot.lane.b32.xlu1 %v589_v37, %s1323_s15 }
 0xa21   :  { %v592_v39 = vpop.permute.xlu1 %591 }
 0xa22   :  { %v594_v40 = vadd.f32 %v592_v39, %v584_v38 }
 0xa24   :  { %1282 = vtanh.f32 %v594_v40 }
 0xa31   :  { %v1283_v41 = vpop.eup %1282 }
 0xa32   :  { %597 = vrot.lane.b32.xlu0 %v1283_v41, %s1322_s3  ;;  %v171_v41 = vadd.f32 %v1502_v62, %v1430_v9  ;;  %v1092_v9 = vld [vmem:[%s1604_s4] ss:$0 sm:$0xff] }
 0xaa4   :  { %v598_v42 = vpop.permute.xlu0 %597 }
 0xaa5   :  { %v600_v43 = vmul.f32 %v598_v42, %v583_v35 }
 0xaa7   :  { %604 = vrot.lane.b32.xlu1 %v600_v43, %s1323_s15 }
 0xb19   :  { %v605_v44 = vpop.permute.xlu1 %604 }
 0xb1a   :  { %1212 = vmatmul.mubr.msk.f32.vlgmr.msra.gmra.mxu0 %vm192_vm5, %v605_v44 }
 0xb1b   :  { %1226 = vmatpush3.msra.mxu0 %v1372_v2  ;;  %1233 = vmatprep.mubr.msk.f32.mxu0 %vm1321_vm1, %v1320_v0 }
 0xb1c   :  { %1227 = vmatprep.subr.mxu0 %v1320_v0 }
 0xb1d   :  { %1228 = vmatpush3.msra.mxu0 %v1386_v5 }
 0xb1e   :  { %1229 = vmatprep.subr.mxu0 %v1320_v0 }
 0xb1f   :  { %1230 = vmatpush3.msra.mxu0 %v1394_v6 }
 0xb20   :  { %1231 = vmatprep.subr.mxu0 %v1320_v0 }
 0xb21   :  { %1232 = vmatpush3.msra.mxu0 %v1402_v7 }
 0xbda   :  { %v674_v46 = vpop.f32.mrf.mxu0 }
 0xbdb   :  { %v678_v47 = vadd.f32 %v674_v46, %v156_v45 }
 0xbdc   :  { %v1213_v48 = vpop.f32.mrf.mxu0 }
 0xbdd   :  { %v1085_v49 = vmul.f32 -1.442695, %v678_v47 }
 0xbdf   :  { %1284 = vpow2.f32 %v1085_v49 }
 0xbe0   :  { %1286 = vtanh.f32 %v678_v47 }
 0xbec   :  { %v1285_v50 = vpop.eup %1284 }
 0xbed   :  { %v682_v51 = vadd.f32 1.0, %v1285_v50  ;;  %v1287_v52 = vpop.eup %1286 }
 0xbef   :  { %1288 = vrcp.f32 %v682_v51 }
 0xbfc   :  { %v1289_v53 = vpop.eup %1288 }
 0xbfd   :  { %v686_v54 = vsel %vm1433_vm4, %v1287_v52, %v1289_v53 }
 0xbfe   :  { %689 = vrot.lane.b32.xlu0 %v686_v54, %s1322_s3  ;;  %v687_v57 = vmul.f32 %v686_v54, %v594_v40 }
 0xc70   :  { %v690_v55 = vpop.permute.xlu0 %689 }
 0xc71   :  { %v692_v56 = vmul.f32 %v690_v55, %v686_v54 }
 0xc73   :  { %694 = vrot.lane.b32.xlu1 %v692_v56, %s1323_s15 }
 0xce5   :  { %v695_v58 = vpop.permute.xlu1 %694 }
 0xce6   :  { %v697_v59 = vadd.f32 %v695_v58, %v687_v57 }
 0xce8   :  { %1290 = vtanh.f32 %v697_v59 }
 0xcf5   :  { %v1291_v61 = vpop.eup %1290 }
 0xcf6   :  { %700 = vrot.lane.b32.xlu0 %v1291_v61, %s1322_s3 }
 0xd68   :  { %v701_v1 = vpop.permute.xlu0 %700 }
 0xd69   :  { %v703_v3 = vmul.f32 %v701_v1, %v686_v54 }
 0xd6b   :  { %707 = vrot.lane.b32.xlu1 %v703_v3, %s1323_s15 }
 0xddd   :  { %v708_v4 = vpop.permute.xlu1 %707 }
 0xdde   :  { %1223 = vmatmul.mubr.msk.f32.vlgmr.msra.gmra.mxu1 %vm192_vm5, %v708_v4 }
 0xddf   :  { %1237 = vmatpush3.msra.mxu1 %v1372_v2  ;;  %1244 = vmatprep.mubr.msk.f32.mxu1 %vm1321_vm1, %v1320_v0 }
 0xde0   :  { %1238 = vmatprep.subr.mxu1 %v1320_v0 }
 0xde1   :  { %1239 = vmatpush3.msra.mxu1 %v1386_v5 }
 0xde2   :  { %1240 = vmatprep.subr.mxu1 %v1320_v0 }
 0xde3   :  { %1241 = vmatpush3.msra.mxu1 %v1394_v6 }
 0xde4   :  { %1242 = vmatprep.subr.mxu1 %v1320_v0 }
 0xde5   :  { %1243 = vmatpush3.msra.mxu1 %v1402_v7 }
 0xe9e   :  { %v777_v10 = vpop.f32.mrf.mxu1 }
 0xe9f   :  { %v781_v2 = vadd.f32 %v777_v10, %v161_v8 }
 0xea0   :  { %v1224_v11 = vpop.f32.mrf.mxu1 }
 0xea1   :  { %v1087_v12 = vmul.f32 -1.442695, %v781_v2 }
 0xea3   :  { %1292 = vpow2.f32 %v1087_v12 }
 0xea4   :  { %1294 = vtanh.f32 %v781_v2  ;;  %v12_v2 = vstv %s1606_s6 }
 0xea5   :  { %13 = vst [vmem:[#allocation3] sm:$0x1] %v12_v2 }
 0xeac   :  { %v1094_v12 = vld [vmem:[#allocation3] ss:$0 sm:$0xff] }
 0xeb0   :  { %v1293_v13 = vpop.eup %1292 }
 0xeb1   :  { %v785_v14 = vadd.f32 1.0, %v1293_v13  ;;  %v1295_v5 = vpop.eup %1294 }
 0xeb3   :  { %1296 = vrcp.f32 %v785_v14 }
 0xec0   :  { %v1297_v15 = vpop.eup %1296 }
 0xec1   :  { %v789_v6 = vsel %vm1433_vm4, %v1295_v5, %v1297_v15 }
 0xec2   :  { %792 = vrot.lane.b32.xlu0 %v789_v6, %s1322_s3  ;;  %v790_v60 = vmul.f32 %v789_v6, %v697_v59 }
 0xf34   :  { %v793_v0 = vpop.permute.xlu0 %792 }
 0xf35   :  { %v795_v7 = vmul.f32 %v793_v0, %v789_v6 }
 0xf37   :  { %797 = vrot.lane.b32.xlu1 %v795_v7, %s1323_s15 }
 0xfa9   :  { %v798_v16 = vpop.permute.xlu1 %797 }
 0xfaa   :  { %v800_v17 = vadd.f32 %v798_v16, %v790_v60 }
 0xfac   :  { %1298 = vtanh.f32 %v800_v17 }
 0xfb9   :  { %v1299_v18 = vpop.eup %1298 }
 0xfba   :  { %803 = vrot.lane.b32.xlu0 %v1299_v18, %s1322_s3 }
0x102c   :  { %v804_v19 = vpop.permute.xlu0 %803 }
0x102d   :  { %v806_v21 = vmul.f32 %v804_v19, %v789_v6 }
0x102f   :  { %810 = vrot.lane.b32.xlu1 %v806_v21, %s1323_s15 }
0x10a1   :  { %v811_v22 = vpop.permute.xlu1 %810 }
0x10a2   :  { %1234 = vmatmul.mubr.msk.f32.vlgmr.msra.gmra.mxu0 %vm192_vm5, %v811_v22 }
0x1162   :  { %v880_v24 = vpop.f32.mrf.mxu0 }
0x1163   :  { %v884_v25 = vadd.f32 %v880_v24, %v166_v23 }
0x1164   :  { %v1235_v26 = vpop.f32.mrf.mxu0 }
0x1165   :  { %v1089_v27 = vmul.f32 -1.442695, %v884_v25 }
0x1167   :  { %1300 = vpow2.f32 %v1089_v27 }
0x1168   :  { %1302 = vtanh.f32 %v884_v25 }
0x1174   :  { %v1301_v28 = vpop.eup %1300 }
0x1175   :  { %v888_v29 = vadd.f32 1.0, %v1301_v28  ;;  %v1303_v30 = vpop.eup %1302 }
0x1177   :  { %1304 = vrcp.f32 %v888_v29 }
0x1184   :  { %v1305_v31 = vpop.eup %1304 }
0x1185   :  { %v892_v32 = vsel %vm1433_vm4, %v1303_v30, %v1305_v31 }
0x1186   :  { %895 = vrot.lane.b32.xlu0 %v892_v32, %s1322_s3  ;;  %v893_v63 = vmul.f32 %v892_v32, %v800_v17 }
0x11f8   :  { %v896_v33 = vpop.permute.xlu0 %895 }
0x11f9   :  { %v898_v34 = vmul.f32 %v896_v33, %v892_v32 }
0x11fb   :  { %900 = vrot.lane.b32.xlu1 %v898_v34, %s1323_s15 }
0x126d   :  { %v901_v35 = vpop.permute.xlu1 %900 }
0x126e   :  { %v903_v36 = vadd.f32 %v901_v35, %v893_v63 }
0x1270   :  { %1306 = vtanh.f32 %v903_v36 }
0x127d   :  { %v1307_v37 = vpop.eup %1306 }
0x127e   :  { %906 = vrot.lane.b32.xlu0 %v1307_v37, %s1322_s3 }
0x12f0   :  { %v907_v38 = vpop.permute.xlu0 %906 }
0x12f1   :  { %v909_v39 = vmul.f32 %v907_v38, %v892_v32 }
0x12f3   :  { %913 = vrot.lane.b32.xlu1 %v909_v39, %s1323_s15 }
0x1365   :  { %v914_v40 = vpop.permute.xlu1 %913 }
0x1366   :  { %1245 = vmatmul.mubr.msk.f32.vlgmr.msra.gmra.mxu1 %vm192_vm5, %v914_v40 }
0x1426   :  { %v983_v42 = vpop.f32.mrf.mxu1 }
0x1427   :  { %v987_v43 = vadd.f32 %v983_v42, %v171_v41 }
0x1428   :  { %v1246_v44 = vpop.f32.mrf.mxu1 }
0x1429   :  { %v1091_v45 = vmul.f32 -1.442695, %v987_v43 }
0x142b   :  { %1308 = vpow2.f32 %v1091_v45 }
0x142c   :  { %1310 = vtanh.f32 %v987_v43 }
0x1438   :  { %v1309_v46 = vpop.eup %1308 }
0x1439   :  { %v991_v47 = vadd.f32 1.0, %v1309_v46  ;;  %v1311_v48 = vpop.eup %1310 }
0x143b   :  { %1312 = vrcp.f32 %v991_v47 }
0x1448   :  { %v1313_v49 = vpop.eup %1312 }
0x1449   :  { %v995_v50 = vsel %vm1433_vm4, %v1311_v48, %v1313_v49 }
0x144a   :  { %998 = vrot.lane.b32.xlu0 %v995_v50, %s1322_s3  ;;  %v996_v62 = vmul.f32 %v995_v50, %v903_v36 }
0x14bc   :  { %v999_v51 = vpop.permute.xlu0 %998 }
0x14bd   :  { %v1001_v52 = vmul.f32 %v999_v51, %v995_v50 }
0x14bf   :  { %1003 = vrot.lane.b32.xlu1 %v1001_v52, %s1323_s15 }
0x14c3   :  { %1019 = vrot.lane.b32.xlu1 %v1092_v9, %s1324_s29 }
0x1531   :  { %v1004_v53 = vpop.permute.xlu1 %1003 }
0x1532   :  { %v1006_v54 = vadd.f32 %v1004_v53, %v996_v62 }
0x1534   :  { %1314 = vtanh.f32 %v1006_v54 }
0x1535   :  { %v1020_v57 = vpop.permute.xlu1 %1019 }
0x1541   :  { %v1315_v55 = vpop.eup %1314 }
0x1542   :  { %1009 = vrot.lane.b32.xlu0 %v1315_v55, %s1322_s3 }
0x1546   :  { %1036 = vrot.lane.b32.xlu0 %v1093_v20, %s1323_s15 }
0x15b4   :  { %v1010_v56 = vpop.permute.xlu0 %1009 }
0x15b5   :  { %v1012_v58 = vmul.f32 %v1010_v56, %v995_v50 }
0x15b7   :  { %v1022_v59 = vmul.f32 %v1020_v57, %v1012_v58 }
0x15b8   :  { %v1037_v61 = vpop.permute.xlu0 %1036 }
0x15b9   :  { %v1039_v1 = vmul.f32 %v1037_v61, %v1006_v54  ;;  %1024 = vrot.lane.b32.xlu1 %v1022_v59, %s1323_s15 }
0x15bb   :  { %1041 = vrot.lane.b32.xlu0 %v1039_v1, %s1324_s29 }
0x162b   :  { %v1025_v3 = vpop.permute.xlu1 %1024 }
0x162c   :  { %v1027_v4 = vsel %vm192_vm5, %v1025_v3, 0.0 }
0x162d   :  { %1028 = vadd.xlane.f32.xlu1 %v1027_v4  ;;  %v1042_v8 = vpop.permute.xlu0 %1041 }
0x162e   :  { %v1044_v10 = vsel %vm192_vm5, %v1042_v8, 0.0 }
0x162f   :  { %1045 = vadd.xlane.f32.xlu0 %v1044_v10 }
0x16b6   :  { %v1029_v11 = vpop.xlane.xlu1 %1028 }
0x16b8   :  { %v1046_v13 = vpop.xlane.xlu0 %1045 }
0x16b9   :  { %v1047_v14 = vadd.f32 %v1046_v13, %v1029_v11 }
0x16bb   :  { %v1055_v5 = vadd.f32 %v1094_v12, %v1047_v14 }
0x16bd   :  { %v1095_v15 = vmul.f32 -1.442695, %v1055_v5 }
0x16bf   :  { %1316 = vpow2.f32 %v1095_v15 }
0x16cc   :  { %v1317_v6 = vpop.eup %1316 }
0x16cd   :  { %v1059_v0 = vadd.f32 1.0, %v1317_v6 }
0x16cf   :  { %1318 = vrcp.f32 %v1059_v0 }
0x16dc   :  { %v1319_v7 = vpop.eup %1318 }
0x16dd   :  { %1063 = vst.msk [vmem:[%s1607_s7] sm:$0xff] %vm1062_vm6, %v1319_v7 }

</bundles_post_ra>
